<compile_context>
chip_gen: v5e
topology: v5e:2x2
jax: 0.10.0
libtpu: 0.0.40
codegen_flags: <defaults>
</compile_context>

<pallas_src>
import numpy as np
import jax
import jax.numpy as jnp
from jax import lax
from jax.experimental import pallas as pl
from jax.experimental.pallas import tpu as pltpu


LRELU_SLOPE = 0.1
VMEM_LIMIT_BYTES = 48 * 1024 * 1024

# (cin, cout, kernel, stride, groups, padding) -- from DiscriminatorS.__init__
CONV_CFGS = [
    (1,    128,  15, 1, 1,  7),
    (128,  128,  41, 2, 4,  20),
    (128,  256,  41, 2, 16, 20),
    (256,  512,  41, 4, 16, 20),
    (512,  1024, 41, 4, 16, 20),
    (1024, 1024, 41, 1, 16, 20),
    (1024, 1024, 5,  1, 1,  2),
]
POST_CFG = (1024, 1, 3, 1, 1, 1)


def _cdiv(a, b):
    return -(-a // b)


def _round_up(n, m):
    return _cdiv(n, m) * m


# ------------------------------ Pallas kernel ------------------------------ #

def _make_conv_kernel(*, K, stride, L_t, copy_rows, halo_rows, use_halo,
                      slope, xp_dtype):
    """One grid cell = one (batch, channel-block, time-tile) output tile."""

    def _compute(w_ref, b_ref, y_ref, xp_ref, acc_ref):
        def tap(k):
            if stride == 1:
                win = xp_ref[k:k + L_t, :]                       # contiguous rows
            else:
                win = xp_ref[pl.ds(k, L_t, stride=stride), :]    # stride in-kernel
            return win.astype(jnp.bfloat16)                      # bf16 MXU operand

        # K-tap reduction fully in-kernel (no reduction grid axis).
        acc_ref[...] = jnp.dot(tap(0), w_ref[0, 0],
                               preferred_element_type=jnp.float32)
        for k in range(1, K):
            acc_ref[...] += jnp.dot(tap(k), w_ref[0, k],
                                    preferred_element_type=jnp.float32)

        y = acc_ref[...] + b_ref[0]                              # (L_t, Cout_blk)
        if slope is not None:
            y = jnp.where(y >= 0, y, slope * y)                  # leaky_relu(0.1)
        y_ref[0] = y.astype(y_ref.dtype)

    if use_halo:
        def kernel(x_ref, xh_ref, w_ref, b_ref, y_ref, xp_ref, acc_ref):
            # assemble [main tile | halo rows from the next tile] in VMEM scratch
            xp_ref[0:copy_rows, :] = x_ref[0].astype(xp_dtype)
            if halo_rows > 0:
                xp_ref[copy_rows:copy_rows + halo_rows, :] = (
                    xh_ref[0, 0:halo_rows, :].astype(xp_dtype))
            _compute(w_ref, b_ref, y_ref, xp_ref, acc_ref)
    else:
        def kernel(x_ref, w_ref, b_ref, y_ref, xp_ref, acc_ref):
            xp_ref[0:copy_rows, :] = x_ref[0].astype(xp_dtype)
            _compute(w_ref, b_ref, y_ref, xp_ref, acc_ref)

    return kernel


def conv1d_pallas(x, layer, *, lt_max=1024):
    """Grouped / strided Conv1d (+ optional fused leaky_relu).

    x:     (B, T, Cin) channels-last
    layer: dict holding packed bf16 weight blocks (G, K, Cin_blk, Cout_blk),
           f32 bias blocks (G, 1, Cout_blk) and conv hyper-params.
    returns (B, L, G * Cout_blk) bf16.
    """
    K, stride, pad = layer["K"], layer["stride"], layer["pad"]
    grouped, slope = layer["grouped"], layer["slope"]
    w_blk, b_blk = layer["w_blocks"], layer["b_blocks"]

    B, T, Cin = x.shape
    G, Kw, Cin_blk, Cout_blk = w_blk.shape
    assert Kw == K
    assert Cin == (G * Cin_blk if grouped else Cin_blk)
    Cout = G * Cout_blk

    L = (T + 2 * pad - K) // stride + 1
    assert L > 0

    # ---- time tiling plan --------------------------------------------------
    NT = _cdiv(L, lt_max)
    if NT > 1:
        min_lt = _cdiv(max(K - stride, 0), stride)
        L_t = max(_round_up(_cdiv(L, NT), 8), _round_up(max(min_lt, 1), 8))
        NT = _cdiv(L, L_t)
    if NT <= 1:
        NT, L_t = 1, L
        Ls = T + 2 * pad                  # x time block == whole padded signal
        halo_rows, use_halo = 0, False
        T_in, L_out = T + 2 * pad, L
        xp_rows, copy_rows = _round_up(T_in, 8), T_in
    else:
        Ls = L_t * stride
        halo_rows = max(K - stride, 0)
        use_halo = halo_rows > 0
        assert Ls >= halo_rows
        T_in = max((NT + (1 if use_halo else 0)) * Ls, T + 2 * pad)
        L_out = NT * L_t
        xp_rows, copy_rows = Ls + _round_up(K, 8), Ls

    # ---- glue: cast to bf16, zero-pad time only ----------------------------
    x = x.astype(jnp.bfloat16)
    pad_r = T_in - T - pad
    if pad > 0 or pad_r > 0:
        x = jnp.pad(x, ((0, 0), (pad, pad_r), (0, 0)))

    # strided sublane reads use an f32 scratch copy (32-bit strided loads);
    # stride-1 layers keep the scratch in bf16.
    xp_dtype = jnp.float32 if stride > 1 else jnp.bfloat16

    if grouped:
        x_idx_main = lambda b, g, t: (b, t, g)
        x_idx_halo = lambda b, g, t: (b, t + 1, g)
    else:
        x_idx_main = lambda b, g, t: (b, t, 0)
        x_idx_halo = lambda b, g, t: (b, t + 1, 0)

    in_specs = [pl.BlockSpec((1, Ls, Cin_blk), x_idx_main)]
    inputs = [x]
    if use_halo:
        in_specs.append(pl.BlockSpec((1, Ls, Cin_blk), x_idx_halo))
        inputs.append(x)
    in_specs += [
        pl.BlockSpec((1, K, Cin_blk, Cout_blk), lambda b, g, t: (g, 0, 0, 0)),
        pl.BlockSpec((1, 1, Cout_blk), lambda b, g, t: (g, 0, 0)),
    ]
    inputs += [w_blk, b_blk]

    kernel = _make_conv_kernel(K=K, stride=stride, L_t=L_t, copy_rows=copy_rows,
                               halo_rows=halo_rows, use_halo=use_halo,
                               slope=slope, xp_dtype=xp_dtype)

    y = pl.pallas_call(
        kernel,
        out_shape=jax.ShapeDtypeStruct((B, L_out, Cout), jnp.bfloat16),
        grid_spec=pltpu.PrefetchScalarGridSpec(
            num_scalar_prefetch=0,
            grid=(B, G, NT),
            in_specs=in_specs,
            out_specs=pl.BlockSpec((1, L_t, Cout_blk), lambda b, g, t: (b, t, g)),
            scratch_shapes=[
                pltpu.VMEM((xp_rows, Cin_blk), xp_dtype),     # padded input tile
                pltpu.VMEM((L_t, Cout_blk), jnp.float32),     # f32 accumulator
            ]),
        compiler_params=pltpu.CompilerParams(
            dimension_semantics=("parallel", "parallel", "parallel"),
            vmem_limit_bytes=VMEM_LIMIT_BYTES),
    )(*inputs)

    if L_out > L:
        y = y[:, :L, :]
    return y


# --------------------------- parameter packing ----------------------------- #

def _pack_grouped_weight(w_oik, groups, spg):
    """torch (Cout, Cin/g, K) -> supergrouped (G, K, spg*Cin/g, spg*Cout/g)."""
    w = np.asarray(w_oik, np.float32)
    cout, cin_g, K = w.shape
    cout_g = cout // groups
    G = groups // spg
    wb = np.zeros((G, K, spg * cin_g, spg * cout_g), np.float32)
    for grp in range(groups):
        sg, j = divmod(grp, spg)
        blk = np.transpose(w[grp * cout_g:(grp + 1) * cout_g], (2, 1, 0))
        wb[sg, :, j * cin_g:(j + 1) * cin_g,
           j * cout_g:(j + 1) * cout_g] = blk
    return wb


def _pack_dense_weight(w_oik, cout_tiles, cout_pad):
    """torch (Cout, Cin, K) -> Cout-tiled (G, K, Cin, Cout_pad/G)."""
    w = np.asarray(w_oik, np.float32)
    cout, cin, K = w.shape
    wk = np.transpose(w, (2, 1, 0))                       # (K, Cin, Cout)
    if cout_pad > cout:
        wk = np.pad(wk, ((0, 0), (0, 0), (0, cout_pad - cout)))
    cout_blk = cout_pad // cout_tiles
    wb = wk.reshape(K, cin, cout_tiles, cout_blk).transpose(2, 0, 1, 3)
    return np.ascontiguousarray(wb)


def _pack_first_weight(w_oik, k_pad):
    """First layer (Cin=1): taps become the contraction dim of a K=1 conv."""
    w = np.asarray(w_oik, np.float32)                     # (Cout, 1, K)
    cout, _, K = w.shape
    wb = np.zeros((1, 1, k_pad, cout), np.float32)
    wb[0, 0, :K, :] = w[:, 0, :].T
    return wb


def _pack_bias(b, G, cout_blk):
    b = np.asarray(b, np.float32)
    tot = G * cout_blk
    if tot > b.shape[0]:
        b = np.pad(b, (0, tot - b.shape[0]))
    return b.reshape(G, 1, cout_blk)


def _plan(cin, cout, groups):
    if groups == 1:
        cout_pad = _round_up(cout, 128)
        cout_blk = 256 if cout_pad % 256 == 0 else cout_pad
        return dict(grouped=False, G=cout_pad // cout_blk, cout_blk=cout_blk,
                    spg=None, cout_pad=cout_pad)
    cin_g = cin // groups
    spg = min(groups, max(1, 128 // cin_g))
    assert groups % spg == 0
    return dict(grouped=True, G=groups // spg, cout_blk=spg * (cout // groups),
                spg=spg, cout_pad=cout)


def _make_conv_weights(key, cin, cout, K, groups):
    """weight_norm(Conv1d) init: v ~ N(0, .05^2), g = ||v||  =>  w == v."""
    kv, kb = jax.random.split(key)
    v = jax.random.normal(kv, (cout, cin // groups, K), jnp.float32) * 0.05
    norm = jnp.sqrt(jnp.sum(v * v, axis=(1, 2), keepdims=True)) + 1e-12
    w = norm * (v / norm)
    b = jax.random.normal(kb, (cout,), jnp.float32) * 0.02
    return np.asarray(w), np.asarray(b)


def init_discriminator_s_params(key):
    cfgs = CONV_CFGS + [POST_CFG]
    keys = jax.random.split(key, len(cfgs))
    layers = []
    for i, ((cin, cout, K, stride, groups, pad), k) in enumerate(zip(cfgs, keys)):
        w, b = _make_conv_weights(k, cin, cout, K, groups)
        is_post = (i == len(cfgs) - 1)
        slope = None if is_post else LRELU_SLOPE
        if i == 0:
            k_pad = _round_up(K, 8)
            layer = dict(K=1, stride=1, pad=0, grouped=False, slope=slope,
                         w_blocks=jnp.asarray(_pack_first_weight(w, k_pad),
                                              jnp.bfloat16),
                         b_blocks=jnp.asarray(_pack_bias(b, 1, cout), jnp.float32),
                         im2col_K=K, im2col_pad=pad, cout=cout)
        else:
            plan = _plan(cin, cout, groups)
            if plan["grouped"]:
                wb = _pack_grouped_weight(w, groups, plan["spg"])
            else:
                wb = _pack_dense_weight(w, plan["G"], plan["cout_pad"])
            layer = dict(K=K, stride=stride, pad=pad, grouped=plan["grouped"],
                         slope=slope,
                         w_blocks=jnp.asarray(wb, jnp.bfloat16),
                         b_blocks=jnp.asarray(_pack_bias(b, plan["G"],
                                                         plan["cout_blk"]),
                                              jnp.float32),
                         cout=cout)
        layer.update(cfg=(cin, cout, K, stride, groups, pad),
                     w_raw=jnp.asarray(w), b_raw=jnp.asarray(b))
        layers.append(layer)
    return {"convs": layers[:-1], "post": layers[-1]}


# --------------------------------- forward --------------------------------- #

def _im2col_first(x_bt, K, pad, k_pad):
    B, T = x_bt.shape
    xp = jnp.pad(x_bt, ((0, 0), (pad, pad)))
    cols = [xp[:, j:j + T] for j in range(K)]
    cols += [jnp.zeros((B, T), xp.dtype)] * (k_pad - K)
    return jnp.stack(cols, axis=-1)                       # (B, T, k_pad)


def _ref_conv_ncw(x_ncw, w_oik, bias, stride, pad, groups, slope):
    """Plain-JAX reference (bf16-rounded weights), used only for self-checks."""
    w = w_oik.astype(jnp.bfloat16).astype(jnp.float32)
    y = lax.conv_general_dilated(
        x_ncw.astype(jnp.float32), w, window_strides=(stride,),
        padding=[(pad, pad)], dimension_numbers=("NCH", "OIH", "NCH"),
        feature_group_count=groups, precision=lax.Precision.HIGHEST)
    y = y + bias[None, :, None]
    if slope is not None:
        y = jnp.where(y >= 0, y, slope * y)
    return y


def _check_close(name, y_ntc, ref_ncw, atol=2e-2, rtol=2e-2):
    got = jnp.transpose(y_ntc.astype(jnp.float32), (0, 2, 1))
    err = float(jnp.max(jnp.abs(got - ref_ncw)))
    bound = atol + rtol * float(jnp.max(jnp.abs(ref_ncw)))
    assert err <= bound, f"{name}: max|err|={err:.4f} > {bound:.4f}"


def discriminator_s_forward(x_ncw, params, *, lt_max=1024, check=False):
    """x_ncw: (B, 1, T) like the PyTorch module. Returns (x_flat, fmap)."""
    l0 = params["convs"][0]
    h = _im2col_first(x_ncw[:, 0, :].astype(jnp.bfloat16),
                      l0["im2col_K"], l0["im2col_pad"], l0["w_blocks"].shape[2])

    fmap, prev = [], None
    for i, layer in enumerate(params["convs"]):
        y = conv1d_pallas(h, layer, lt_max=lt_max)
        if check:
            _, _, K, stride, groups, pad = layer["cfg"]
            ref_in = (x_ncw.astype(jnp.bfloat16).astype(jnp.float32) if i == 0
                      else jnp.transpose(prev.astype(jnp.float32), (0, 2, 1)))
            ref = _ref_conv_ncw(ref_in, layer["w_raw"], layer["b_raw"],
                                stride, pad, groups, layer["slope"])
            _check_close(f"conv{i}", y, ref)
        fmap.append(y)                                    # channels-last bf16
        prev = y
        h = y

    post = params["post"]
    y = conv1d_pallas(h, post, lt_max=lt_max)
    y = y[:, :, :post["cout"]]                            # drop lane padding -> (B, L, 1)
    if check:
        _, _, K, stride, groups, pad = post["cfg"]
        ref = _ref_conv_ncw(jnp.transpose(prev.astype(jnp.float32), (0, 2, 1)),
                            post["w_raw"], post["b_raw"], stride, pad, groups, None)
        _check_close("conv_post", y, ref)
    fmap.append(y)

    x_flat = y[:, :, 0].astype(jnp.float32)               # torch.flatten(x, 1, -1)
    return x_flat, fmap


# ----------------------------------- main ----------------------------------- #

if __name__ == "__main__":
    root = jax.random.PRNGKey(0)
    kx1, kx2, kp = jax.random.split(root, 3)
    params = init_discriminator_s_params(kp)

    def expected_len(T):
        t = T
        for (_, _, K, s, _, p) in CONV_CFGS + [POST_CFG]:
            t = (t + 2 * p - K) // s + 1
        return t

    # 1) small clip: default (untiled) path, per-layer check against lax.conv
    B, T = 2, 128
    x = jax.random.normal(kx1, (B, 1, T), jnp.float32)
    out, fmap = discriminator_s_forward(x, params, check=True)
    out = jax.block_until_ready(out)
    for f in fmap:
        jax.block_until_ready(f)
    assert out.shape == (B, expected_len(T)), out.shape
    assert len(fmap) == len(CONV_CFGS) + 1

    # 2) longer clip with tiny time tiles: exercises the time-tiled + halo path
    B2, T2 = 1, 384
    x2 = jax.random.normal(kx2, (B2, 1, T2), jnp.float32)
    out2, fmap2 = discriminator_s_forward(x2, params, lt_max=16, check=True)
    out2 = jax.block_until_ready(out2)
    assert out2.shape == (B2, expected_len(T2)), out2.shape

    print("KERNEL_OK")
</pallas_src>

<mosaic_0001>
module attributes {stable_mosaic.version = 11 : i64} {
  func.func @kernel(%arg0: i32, %arg1: i32, %arg2: i32, %arg3: memref<1x128x16xbf16, #tpu.memory_space<vmem>>, %arg4: memref<1x1x16x128xbf16, #tpu.memory_space<vmem>>, %arg5: memref<1x1x128xf32, #tpu.memory_space<vmem>>, %arg6: memref<1x128x128xbf16, #tpu.memory_space<vmem>>, %arg7: memref<128x16xbf16, #tpu.memory_space<vmem>>, %arg8: memref<128x128xf32, #tpu.memory_space<vmem>>) attributes {dimension_semantics = [#tpu.dimension_semantics<parallel>, #tpu.dimension_semantics<parallel>, #tpu.dimension_semantics<parallel>], iteration_bounds = array<i64: 2, 1, 1>, scalar_prefetch = 0 : i64, scratch_operands = 2 : i64, tpu.core_type = #tpu.core_type<tc>, window_params = [{transform_indices = @transform_0, window_bounds = array<i64: 1, 128, 16>}, {transform_indices = @transform_1, window_bounds = array<i64: 1, 1, 16, 128>}, {transform_indices = @transform_2, window_bounds = array<i64: 1, 1, 128>}, {transform_indices = @transform_3, window_bounds = array<i64: 1, 128, 128>}]} {
    %c0 = arith.constant 0 : index
    %c0_0 = arith.constant 0 : index
    %c0_1 = arith.constant 0 : index
    %0 = vector.load %arg3[%c0, %c0_0, %c0_1] : memref<1x128x16xbf16, #tpu.memory_space<vmem>>, vector<1x128x16xbf16>
    %1 = vector.shape_cast %0 : vector<1x128x16xbf16> to vector<128x16xbf16>
    %c0_2 = arith.constant 0 : index
    %c0_3 = arith.constant 0 : index
    %2 = vector.load %arg7[%c0_2, %c0_3] : memref<128x16xbf16, #tpu.memory_space<vmem>>, vector<128x16xbf16>
    tpu.vector_store %arg7[%c0_2, %c0_3], %1 {strides = array<i32>} : memref<128x16xbf16, #tpu.memory_space<vmem>>, vector<128x16xbf16>,
    %c0_4 = arith.constant 0 : index
    %c0_5 = arith.constant 0 : index
    %3 = vector.load %arg7[%c0_4, %c0_5] : memref<128x16xbf16, #tpu.memory_space<vmem>>, vector<128x16xbf16>
    %c0_6 = arith.constant 0 : index
    %c0_7 = arith.constant 0 : index
    %c0_8 = arith.constant 0 : index
    %c0_9 = arith.constant 0 : index
    %4 = vector.load %arg4[%c0_6, %c0_7, %c0_8, %c0_9] : memref<1x1x16x128xbf16, #tpu.memory_space<vmem>>, vector<1x1x16x128xbf16>
    %5 = vector.shape_cast %4 : vector<1x1x16x128xbf16> to vector<16x128xbf16>
    %cst = arith.constant dense<0.000000e+00> : vector<128x128xf32>
    %6 = tpu.matmul %3, %5, %cst {dimension_numbers = #tpu.dot_dimension_numbers<[1], [0], [0], [1], [0, 0, 1, 1], [], []>} : vector<128x16xbf16>, vector<16x128xbf16>, vector<128x128xf32> -> vector<128x128xf32>
    %c0_10 = arith.constant 0 : index
    %c0_11 = arith.constant 0 : index
    %7 = vector.load %arg8[%c0_10, %c0_11] : memref<128x128xf32, #tpu.memory_space<vmem>>, vector<128x128xf32>
    tpu.vector_store %arg8[%c0_10, %c0_11], %6 {strides = array<i32>} : memref<128x128xf32, #tpu.memory_space<vmem>>, vector<128x128xf32>,
    %c0_12 = arith.constant 0 : index
    %c0_13 = arith.constant 0 : index
    %8 = vector.load %arg8[%c0_12, %c0_13] : memref<128x128xf32, #tpu.memory_space<vmem>>, vector<128x128xf32>
    %c0_14 = arith.constant 0 : index
    %c0_15 = arith.constant 0 : index
    %c0_16 = arith.constant 0 : index
    %9 = vector.load %arg5[%c0_14, %c0_15, %c0_16] : memref<1x1x128xf32, #tpu.memory_space<vmem>>, vector<1x1x128xf32>
    %10 = vector.shape_cast %9 : vector<1x1x128xf32> to vector<1x128xf32>
    %11 = vector.broadcast %10 : vector<1x128xf32> to vector<128x128xf32>
    %12 = arith.addf %8, %11 : vector<128x128xf32>
    %cst_17 = arith.constant 0.000000e+00 : f32
    %13 = vector.broadcast %cst_17 : f32 to vector<128x128xf32>
    %14 = arith.cmpf oge, %12, %13 : vector<128x128xf32>
    %cst_18 = arith.constant 1.000000e-01 : f32
    %15 = vector.broadcast %cst_18 : f32 to vector<128x128xf32>
    %16 = arith.mulf %15, %12 : vector<128x128xf32>
    %17 = arith.select %14, %12, %16 : vector<128x128xi1>, vector<128x128xf32>
    %18 = arith.truncf %17 : vector<128x128xf32> to vector<128x128xbf16>
    %c0_19 = arith.constant 0 : index
    %c0_20 = arith.constant 0 : index
    %c0_21 = arith.constant 0 : index
    %19 = vector.load %arg6[%c0_19, %c0_20, %c0_21] : memref<1x128x128xbf16, #tpu.memory_space<vmem>>, vector<1x128x128xbf16>
    %20 = vector.shape_cast %19 : vector<1x128x128xbf16> to vector<128x128xbf16>
    %21 = vector.shape_cast %18 : vector<128x128xbf16> to vector<1x128x128xbf16>
    tpu.vector_store %arg6[%c0_19, %c0_20, %c0_21], %21 {strides = array<i32>} : memref<1x128x128xbf16, #tpu.memory_space<vmem>>, vector<1x128x128xbf16>,
    return
  }
  func.func @transform_0(%arg0: i32, %arg1: i32, %arg2: i32) -> (i32, i32, i32) {
    %c0_i32 = arith.constant 0 : i32
    %c0_i32_0 = arith.constant 0 : i32
    return %arg0, %arg2, %c0_i32 : i32, i32, i32
  }
  func.func @transform_1(%arg0: i32, %arg1: i32, %arg2: i32) -> (i32, i32, i32, i32) {
    %c0_i32 = arith.constant 0 : i32
    %c0_i32_0 = arith.constant 0 : i32
    %c0_i32_1 = arith.constant 0 : i32
    %c0_i32_2 = arith.constant 0 : i32
    return %arg1, %c0_i32, %c0_i32_0, %c0_i32_1 : i32, i32, i32, i32
  }
  func.func @transform_2(%arg0: i32, %arg1: i32, %arg2: i32) -> (i32, i32, i32) {
    %c0_i32 = arith.constant 0 : i32
    %c0_i32_0 = arith.constant 0 : i32
    %c0_i32_1 = arith.constant 0 : i32
    return %arg1, %c0_i32, %c0_i32_0 : i32, i32, i32
  }
  func.func @transform_3(%arg0: i32, %arg1: i32, %arg2: i32) -> (i32, i32, i32) {
    %c0_i32 = arith.constant 0 : i32
    return %arg0, %arg2, %arg1 : i32, i32, i32
  }
}

</mosaic_0001>

<bundles_post_ra>
// kernel: tpu_custom_call.1
= control target key start
LH: loop header
LB: loop body
LE: loop exit
PB: predicated region body
PF: predicated region fallthrough
CT: control target
= control target key end

     0   :  { %8 = vsyncpa [#allocation5], 0  ;;  %s1134_s0 = inlined_call_operand.vmem [shape: bf16[2,128,16], index: 0, kind: input, shape index: {}]   ;;  %s1135_s1 = inlined_call_operand.vmem [shape: bf16[1,1,16,128], index: 1, kind: input, shape index: {}]   ;;  %s1136_s2 = inlined_call_operand.vmem [shape: f32[1,1,128], index: 2, kind: input, shape index: {}]   ;;  %s1137_s3 = inlined_call_operand.hbm [shape: bf16[2,128,128], index: 3, kind: output, shape index: {}]  }
   0x1   :  { %10 = vsyncpa [#allocation5 + $0x1], 0  ;;  %s956_s12 = smov 0   ;;  %s958_s13 = smov 0  }
   0x2   :  { %s960_s14 = smov 0   ;;  %s962_s15 = smov 0  }
   0x3   :  { %s964_s16 = smov 0   ;;  %s966_s17 = smov 0  }
   0x4 LB: > { %s676_s18 = sadd.s32 4294967295, %s932_s17   ;;  %s677_s19 = sadd.s32 4294967294, %s932_s17   ;;  %s932_s17 = sphi %s966_s17, %s16_s17   ;;  %s928_s16 = sphi %s964_s16, %s1144_s16   ;;  %s924_s15 = sphi %s962_s15, %s1143_s15   ;;  %s920_s14 = sphi %s960_s14, %s1142_s14   ;;  %s916_s13 = sphi %s958_s13, %s1141_s13   ;;  %s912_s12 = sphi %s956_s12, %s1140_s12  }
   0x5   : > { %s35_s20 = sadd.s32 1, %s928_s16  ;;  %s126_s21 = sadd.s32 1, %s920_s14 }
   0x6   : > { %p37_p0 = scmp.ge.s32.totalorder %s35_s20, 2  ;;  %p136_p1 = scmp.ne.s32.totalorder %s920_s14, %s916_s13 }
   0x7   : > { %p137_p2 = scmp.eq.s32.totalorder %s676_s18, 1  ;;  %p142_p3 = scmp.ne.s32.totalorder %s916_s13, %s912_s12 }
   0x8   : > { %s1146_s20 = smov (%p37_p0, %s35_s20), 0  ;;  %p143_p5 = scmp.eq.s32.totalorder %s677_s19, 1 }
   0x9   : > { %p996_p4 = por %p137_p2, %p136_p1  ;;  %s119_s23 = ssub.s32 %s928_s16, %s1146_s20 }
   0xa   : > { %p682_p6 = scmp.ge.s32.totalorder %s932_s17, 1  ;;  %p124_p7 = scmp.eq.s32.totalorder %s119_s23, 0 }
   0xb   : > { %p1003_p8 = por %p143_p5, %p142_p3  ;;  %p188_p9 = scmp.lt.s32.totalorder %s932_s17, 3 }
   0xc   : > { %s1009_s25 = scalar_select %p124_p7, %s920_s14, %s126_s21  }
   0xd   : > { %p189_p10 = pnand %p682_p6, %p188_p9 }
   0xe   : > { %p225_p11 = scmp.lt.s32.totalorder (!%p189_p10), %s924_s15, 1  ;;  %s221_s8 = sand.u32 (!%p189_p10), 1, %s916_s13  }
   0xf   : > { %192 = sbr.rel (%p189_p10) target bundleno = 207 (0xcf), region = 32  ;;  %s683_s9 = sshll.u32 (!%p189_p10), %s221_s8, 6 }
  0x10   : > { %s1075_s10 = scalar_lea.vmem (!%p189_p10), [#allocation4], %s683_s9  ;;  %s745_s11 = sshll.u32 (!%p189_p10), %s924_s15, 6 }
  0x11   : > { %s562_s21 = scalar_lea.hbm (!%p189_p10), %s1137_s3, %s745_s11  ;;  %s548_s26 = scalar_lea.sflag (!%p189_p10), [#allocation5], %s221_s8 }
  0x12   : > { %s565_s23 = sshll.u32 (!%p189_p10), %s562_s21, 4  ;;  %s874_s4 = scalar_lea.hbm (!%p189_p10), %s1137_s3, 128  ;;  %s566_s23 = int_to_ptr.hbm [resolvable:$true] %s565_s23 }
  0x13   : > { %s868_s27 = sshra.s32 (!%p189_p10), %s566_s23, 4  ;;  %s869_s27 = int_to_ptr.hbm [resolvable:$true] %s868_s27 }
  0x14   : > { %v744_v0 = vld [vmem:[%s1135_s1] sm:$0xff]  ;;  %s226_s28 = scalar_select %p225_p11, %s924_s15, 1  ;;  %vm260_vm0 = vcmask 125952   ;;  %vm341_vm1 = vcmask 130048  }
  0x15   : > { %373 = vmatpush.bf16.msra.mxu0 %v744_v0  ;;  %793 = vmatpush.bf16.msra.mxu1 %v744_v0  ;;  %v1064_v26 = vld [vmem:[%s1136_s2] ss:$0 sm:$0xff]  ;;  %s563_s15 = sshll.u32 %s1075_s10, 4  ;;  %p875_p1 = scmp.lt.s32.totalorder %s869_s27, %s1137_s3  ;;  %s564_s15 = int_to_ptr.vmem [resolvable:$true] %s563_s15 }
  0x16   : > { %794 = vmatpush.bf16.msra.mxu2 %v744_v0  ;;  %795 = vmatpush.bf16.msra.mxu3 %v744_v0  ;;  %s735_s29 = sshll.u32 %s226_s28, 6  ;;  %s870_s28 = scalar_lea.hbm %s869_s27, 64 }
  0x17   : > { %s1019_s5 = scalar_lea.vmem %s1134_s0, %s735_s29  ;;  %p871_p12 = scmp.ne.s32.totalorder %s869_s27, %s870_s28 }
  0x18   : > { %v244_v1 = vld [vmem:[%s1019_s5] sm:$0xf]  ;;  %v245_v2 = vld [vmem:[%s1019_s5 + $0x4] sm:$0xf]  ;;  %v248_v3 = vld [vmem:[%s1019_s5 + $0x10] sm:$0xf]  ;;  %p876_p2 = scmp.lt.s32.totalorder %s874_s4, %s870_s28 }
  0x19   : > { %261 = vst.msk [vmem:[#allocation2] sm:$0xf] %vm260_vm0, %v244_v1  ;;  %v249_v4 = vld [vmem:[%s1019_s5 + $0x14] sm:$0xf]  ;;  %v252_v5 = vld [vmem:[%s1019_s5 + $0x20] sm:$0xf]  ;;  %p872_p13 = pnand %p871_p12, %p996_p4 }
  0x1a   : > { %262 = vst.msk [vmem:[#allocation2 + $0x4] sm:$0xf] %vm260_vm0, %v245_v2  ;;  %v253_v6 = vld [vmem:[%s1019_s5 + $0x24] sm:$0xf]  ;;  %v256_v7 = vld [vmem:[%s1019_s5 + $0x30] sm:$0xf]  ;;  %p877_p3 = por %p876_p2, %p875_p1 }
  0x1b   : > { %265 = vst.msk [vmem:[#allocation2 + $0x10] sm:$0xf] %vm260_vm0, %v248_v3  ;;  %v257_v8 = vld [vmem:[%s1019_s5 + $0x34] sm:$0xf]  ;;  %v246_v9 = vld [vmem:[%s1019_s5 + $0x8] sm:$0xf]  ;;  %p873_p0 = pneg %p872_p13 }
  0x1c   : > { %266 = vst.msk [vmem:[#allocation2 + $0x14] sm:$0xf] %vm260_vm0, %v249_v4  ;;  %v247_v10 = vld [vmem:[%s1019_s5 + $0xc] sm:$0xf]  ;;  %v250_v11 = vld [vmem:[%s1019_s5 + $0x18] sm:$0xf] }
  0x1d   : > { %269 = vst.msk [vmem:[#allocation2 + $0x20] sm:$0xf] %vm260_vm0, %v252_v5  ;;  %v251_v13 = vld [vmem:[%s1019_s5 + $0x1c] sm:$0xf]  ;;  %v254_v14 = vld [vmem:[%s1019_s5 + $0x28] sm:$0xf]  ;;  %p878_p5 = pnand %p877_p3, %p873_p0 }
  0x1e   : > { %270 = vst.msk [vmem:[#allocation2 + $0x24] sm:$0xf] %vm260_vm0, %v253_v6  ;;  %v255_v16 = vld [vmem:[%s1019_s5 + $0x2c] sm:$0xf]  ;;  %v258_v17 = vld [vmem:[%s1019_s5 + $0x38] sm:$0xf] }
  0x1f   : > { %273 = vst.msk [vmem:[#allocation2 + $0x30] sm:$0xf] %vm260_vm0, %v256_v7  ;;  %v259_v19 = vld [vmem:[%s1019_s5 + $0x3c] sm:$0xf] }
  0x20   : > { %274 = vst.msk [vmem:[#allocation2 + $0x34] sm:$0xf] %vm260_vm0, %v257_v8 }
  0x21   : > { %v736_v12 = vld [vmem:[#allocation2] sm:$0xff]  ;;  %263 = vst.msk [vmem:[#allocation2 + $0x8] sm:$0xf] %vm260_vm0, %v246_v9 }
  0x22   : > { %264 = vst.msk [vmem:[#allocation2 + $0xc] sm:$0xf] %vm260_vm0, %v247_v10  ;;  %722 = vmatmul.msk.bf16.vlgmr.msra.gmra.mxu0 %vm341_vm1, %v736_v12 }
  0x23   : > { %v738_v15 = vld [vmem:[#allocation2 + $0x10] sm:$0xff]  ;;  %267 = vst.msk [vmem:[#allocation2 + $0x18] sm:$0xf] %vm260_vm0, %v250_v11 }
  0x24   : > { %268 = vst.msk [vmem:[#allocation2 + $0x1c] sm:$0xf] %vm260_vm0, %v251_v13  ;;  %724 = vmatmul.msk.bf16.vlgmr.msra.gmra.mxu1 %vm341_vm1, %v738_v15 }
  0x25   : > { %v740_v18 = vld [vmem:[#allocation2 + $0x20] sm:$0xff]  ;;  %271 = vst.msk [vmem:[#allocation2 + $0x28] sm:$0xf] %vm260_vm0, %v254_v14 }
  0x26   : > { %272 = vst.msk [vmem:[#allocation2 + $0x2c] sm:$0xf] %vm260_vm0, %v255_v16  ;;  %726 = vmatmul.msk.bf16.vlgmr.msra.gmra.mxu2 %vm341_vm1, %v740_v18 }
  0x27   : > { %v742_v20 = vld [vmem:[#allocation2 + $0x30] sm:$0xff]  ;;  %275 = vst.msk [vmem:[#allocation2 + $0x38] sm:$0xf] %vm260_vm0, %v258_v17 }
  0x28   : > { %276 = vst.msk [vmem:[#allocation2 + $0x3c] sm:$0xf] %vm260_vm0, %v259_v19  ;;  %728 = vmatmul.msk.bf16.vlgmr.msra.gmra.mxu3 %vm341_vm1, %v742_v20 }
  0x29   : > { %v737_v21 = vld [vmem:[#allocation2 + $0x8] sm:$0xff] }
  0x2b   : > { %v739_v22 = vld [vmem:[#allocation2 + $0x18] sm:$0xff] }
  0x2d   : > { %v741_v23 = vld [vmem:[#allocation2 + $0x28] sm:$0xff] }
  0x2f   : > { %v743_v24 = vld [vmem:[#allocation2 + $0x38] sm:$0xff] }
  0x32   : > { %723 = vmatmul.msk.bf16.gmra.mxu0 %vm341_vm1, %v737_v21 }
  0x34   : > { %725 = vmatmul.msk.bf16.gmra.mxu1 %vm341_vm1, %v739_v22 }
  0x36   : > { %727 = vmatmul.msk.bf16.gmra.mxu2 %vm341_vm1, %v741_v23 }
  0x38   : > { %729 = vmatmul.msk.bf16.gmra.mxu3 %vm341_vm1, %v743_v24 }
  0x9f   : > { %v375_v25 = vpop.f32.mrf.mxu0 }
  0xa0   : > { %v451_v28 = vadd.f32 %v1064_v26, %v375_v25 }
  0xa1   : > { %v385_v27 = vpop.f32.mrf.mxu1 }
  0xa2   : > { %v455_v29 = vadd.f32 %v1064_v26, %v385_v27  ;;  %v483_v31 = vmul.f32 0.1, %v451_v28  ;;  %vm467_vm2 = vcmp.ge.f32.partialorder %v451_v28, 0.0 }
  0xa4   : > { %v487_v37 = vmul.f32 0.1, %v455_v29  ;;  %v499_v39 = vsel %vm467_vm2, %v451_v28, %v483_v31  ;;  %vm471_vm4 = vcmp.ge.f32.partialorder %v455_v29, 0.0 }
  0xa6   : > { %v503_v44 = vsel %vm471_vm4, %v455_v29, %v487_v37 }
  0xa7   : > { %v377_v30 = vpop.f32.mrf.mxu0 }
  0xa8   : > { %v452_v32 = vadd.f32 %v1064_v26, %v377_v30 }
  0xa9   : > { %v395_v33 = vpop.f32.mrf.mxu2  ;;  %v387_v34 = vpop.f32.mrf.mxu1 }
  0xaa   : > { %vm468_vm3 = vcmp.ge.f32.partialorder %v452_v32, 0.0  ;;  %v484_v35 = vmul.f32 0.1, %v452_v32  ;;  %v456_v36 = vadd.f32 %v1064_v26, %v387_v34  ;;  %v459_v43 = vadd.f32 %v1064_v26, %v395_v33 }
  0xab   : > { %v405_v38 = vpop.f32.mrf.mxu3 }
  0xac   : > { %v500_v40 = vsel %vm468_vm3, %v452_v32, %v484_v35  ;;  %vm472_vm5 = vcmp.ge.f32.partialorder %v456_v36, 0.0  ;;  %v488_v42 = vmul.f32 0.1, %v456_v36  ;;  %v463_v45 = vadd.f32 %v1064_v26, %v405_v38 }
  0xad   : > { %v749_v41 = vpack.c.bf16 %v500_v40, %v499_v39  ;;  %v491_v51 = vmul.f32 0.1, %v459_v43  ;;  %vm475_vm6 = vcmp.ge.f32.partialorder %v459_v43, 0.0 }
  0xae   : > { %v504_v46 = vsel %vm472_vm5, %v456_v36, %v488_v42  ;;  %v495_v53 = vmul.f32 0.1, %v463_v45  ;;  %vm479_vm8 = vcmp.ge.f32.partialorder %v463_v45, 0.0 }
  0xaf   : > { %750 = vst [vmem:[%s1075_s10] sm:$0xff] %v749_v41   ;;  %v380_v47 = vpop.f32.mrf.mxu0  ;;  %v759_v48 = vpack.c.bf16 %v504_v46, %v503_v44  ;;  %v507_v58 = vsel %vm475_vm6, %v459_v43, %v491_v51 }
  0xb0   : > { %v453_v57 = vadd.f32 %v1064_v26, %v380_v47  ;;  %v511_v0 = vsel %vm479_vm8, %v463_v45, %v495_v53 }
  0xb1   : > { %v397_v49 = vpop.f32.mrf.mxu2  ;;  %v390_v50 = vpop.f32.mrf.mxu1  ;;  %787 = vst [vmem:[%s1075_s10 + $0x10] sm:$0xff] %v759_v48  }
  0xb2   : > { %v460_v52 = vadd.f32 %v1064_v26, %v397_v49  ;;  %v457_v62 = vadd.f32 %v1064_v26, %v390_v50  ;;  %v485_v2 = vmul.f32 0.1, %v453_v57  ;;  %vm469_vm10 = vcmp.ge.f32.partialorder %v453_v57, 0.0 }
  0xb3   : > { %v407_v54 = vpop.f32.mrf.mxu3 }
  0xb4   : > { %vm476_vm7 = vcmp.ge.f32.partialorder %v460_v52, 0.0  ;;  %v492_v55 = vmul.f32 0.1, %v460_v52  ;;  %v464_v56 = vadd.f32 %v1064_v26, %v407_v54  ;;  %v489_v9 = vmul.f32 0.1, %v457_v62 }
  0xb5   : > { %v501_v11 = vsel %vm469_vm10, %v453_v57, %v485_v2  ;;  %vm473_vm12 = vcmp.ge.f32.partialorder %v457_v62, 0.0 }
  0xb6   : > { %v508_v59 = vsel %vm476_vm7, %v460_v52, %v492_v55  ;;  %vm480_vm9 = vcmp.ge.f32.partialorder %v464_v56, 0.0  ;;  %v496_v60 = vmul.f32 0.1, %v464_v56  ;;  %v505_v16 = vsel %vm473_vm12, %v457_v62, %v489_v9 }
  0xb7   : > { %v769_v61 = vpack.c.bf16 %v508_v59, %v507_v58  ;;  %v382_v63 = vpop.f32.mrf.mxu0 }
  0xb8   : > { %v512_v1 = vsel %vm480_vm9, %v464_v56, %v496_v60  ;;  %v454_v3 = vadd.f32 %v1064_v26, %v382_v63 }
  0xb9   : > { %789 = vst [vmem:[%s1075_s10 + $0x20] sm:$0xff] %v769_v61   ;;  %v779_v4 = vpack.c.bf16 %v512_v1, %v511_v0  ;;  %v400_v5 = vpop.f32.mrf.mxu2  ;;  %v392_v6 = vpop.f32.mrf.mxu1 }
  0xba   : > { %vm470_vm11 = vcmp.ge.f32.partialorder %v454_v3, 0.0  ;;  %v486_v7 = vmul.f32 0.1, %v454_v3  ;;  %v458_v8 = vadd.f32 %v1064_v26, %v392_v6  ;;  %v461_v15 = vadd.f32 %v1064_v26, %v400_v5 }
  0xbb   : > { %791 = vst [vmem:[%s1075_s10 + $0x30] sm:$0xff] %v779_v4   ;;  %v410_v10 = vpop.f32.mrf.mxu3 }
  0xbc   : > { %v502_v12 = vsel %vm470_vm11, %v454_v3, %v486_v7  ;;  %vm474_vm13 = vcmp.ge.f32.partialorder %v458_v8, 0.0  ;;  %v490_v14 = vmul.f32 0.1, %v458_v8  ;;  %v465_v18 = vadd.f32 %v1064_v26, %v410_v10 }
  0xbd   : > { %v754_v13 = vpack.c.bf16 %v502_v12, %v501_v11  ;;  %v493_v21 = vmul.f32 0.1, %v461_v15  ;;  %vm477_vm14 = vcmp.ge.f32.partialorder %v461_v15, 0.0 }
  0xbe   : > { %v506_v17 = vsel %vm474_vm13, %v458_v8, %v490_v14  ;;  %v497_v24 = vmul.f32 0.1, %v465_v18  ;;  %vm481_vm0 = vcmp.ge.f32.partialorder %v465_v18, 0.0 }
  0xbf   : > { %786 = vst [vmem:[%s1075_s10 + $0x8] sm:$0xff] %v754_v13   ;;  %v764_v19 = vpack.c.bf16 %v506_v17, %v505_v16  ;;  %v509_v28 = vsel %vm477_vm14, %v461_v15, %v493_v21 }
  0xc0   : > { %v513_v32 = vsel %vm481_vm0, %v465_v18, %v497_v24 }
  0xc1   : > { %v402_v20 = vpop.f32.mrf.mxu2  ;;  %788 = vst [vmem:[%s1075_s10 + $0x18] sm:$0xff] %v764_v19  }
  0xc2   : > { %v462_v22 = vadd.f32 %v1064_v26, %v402_v20 }
  0xc3   : > { %v412_v23 = vpop.f32.mrf.mxu3 }
  0xc4   : > { %vm478_vm15 = vcmp.ge.f32.partialorder %v462_v22, 0.0  ;;  %v494_v25 = vmul.f32 0.1, %v462_v22  ;;  %v466_v27 = vadd.f32 %v1064_v26, %v412_v23 }
  0xc6   : > { %v510_v29 = vsel %vm478_vm15, %v462_v22, %v494_v25  ;;  %vm482_vm1 = vcmp.ge.f32.partialorder %v466_v27, 0.0  ;;  %v498_v30 = vmul.f32 0.1, %v466_v27 }
  0xc7   : > { %v774_v31 = vpack.c.bf16 %v510_v29, %v509_v28 }
  0xc8   : > { %v514_v33 = vsel %vm482_vm1, %v466_v27, %v498_v30 }
  0xc9   : > { %790 = vst [vmem:[%s1075_s10 + $0x28] sm:$0xff] %v774_v31   ;;  %v784_v34 = vpack.c.bf16 %v514_v33, %v513_v32 }
  0xcb   : > { %792 = vst [vmem:[%s1075_s10 + $0x38] sm:$0xff] %v784_v34  }
  0xcc   : > { %881 = shalt.err (!%p878_p5)
}
  0xcd   : > { %s934_s7 = smov 64   ;;  %s935_s8 = smov 4  }
  0xce   : > { %796 = dma.vmem_to_hbm [thread:$0]  (%p996_p4), %s564_s15, 1024, %s566_s23, %s548_s26, %s934_s7, %s934_s7, %s935_s8  }
  0xcf PF: > { %p802_p6 = scmp.ge.s32.totalorder %s932_s17, 2  ;;  %s580_s9 = sand.u32 1, %s912_s12  }
  0xd0   : > { %s581_s10 = scalar_lea.sflag [#allocation5], %s580_s9 }
  0xd1   : > { %p799_p7 = pnand %p802_p6, %p1003_p8 }
  0xd3   : > { %p800_p9 = pneg %p799_p7 }
  0xd5   : > { %907 = dma.done.wait (%p800_p9), %s581_s10, 1024  }
  0xd6   : > { %909 = vsyncadd (%p800_p9), %s581_s10, 4294966272  ;;  %s16_s17 = sadd.s32 1, %s932_s17   ;;  %s1140_s12 = smov %s916_s13 }
  0xd7   : > { %p13_p10 = scmp.ge.s32.totalorder %s16_s17, 4   ;;  %s1141_s13 = smov %s920_s14 }
  0xd8   : > { %s1142_s14 = smov %s1009_s25  ;;  %s1143_s15 = smov %s928_s16 }
  0xd9   : > { %s1144_s16 = smov %s1146_s20  ;;  %15 = sbr.rel (!%p13_p10) target bundleno = 4 (0x4), region = 73 }
  0xde   :  { %587 = vsyncpa [#allocation5], 1 }
  0xdf   :  { %589 = vsyncpa [#allocation5 + $0x1], 1 }

</bundles_post_ra>
